<compile_context>
chip_gen: v5e
topology: v5e:2x2
jax: 0.10.0
libtpu: 0.0.40
codegen_flags: <defaults>
</compile_context>

<pallas_src>
import jax
import jax.numpy as jnp
from jax.experimental import pallas as pl
from jax.experimental.pallas import tpu as pltpu


def conv1x1_bn_relu_kernel(x_ref, w_ref, b_ref, o_ref):
    # x_ref: (1, Ci, THW)   w_ref: (TCo, Ci)   b_ref: (TCo, 1) f32   o_ref: (1, TCo, THW)
    y = jnp.dot(w_ref[...], x_ref[0],
                preferred_element_type=jnp.float32)        # (TCo, THW) f32 accum on MXU
    y = y + b_ref[...]                                     # (TCo, 1) broadcast across lanes
    o_ref[0] = jnp.maximum(y, 0.0).astype(o_ref.dtype)     # ReLU, lane-dense native store


def _round_up(x, m):
    return (x + m - 1) // m * m


def _vmem_capacity_bytes():
    try:
        return int(pltpu.get_tpu_info().vmem_capacity_bytes)
    except Exception:
        return 64 << 20        # conservative default: v7x has 64 MiB VMEM per TensorCore


def _select_tiles(B, Ci, Co, HW_pad, x_itemsize, out_itemsize, vmem_cap):
    """Pick (THW, TCo). THW is a multiple of 128 (lane-dense), TCo a multiple of 8.
    Budget counts double-buffered x/out blocks, the f32 (TCo,THW) accumulator/ReLU
    temporary and (double-buffered) weights."""
    budget = min(vmem_cap // 4, 24 << 20)   # ~16 MiB on v7x (64 MiB VMEM), 24 MiB on v5e/v6e

    def step_bytes(thw, tco):
        x_blk = 2 * Ci * thw * x_itemsize              # double-buffered activation block
        o_blk = 2 * tco * thw * out_itemsize           # double-buffered output block
        tmp = 2 * tco * thw * 4                        # f32 accumulator + bias/ReLU temp
        w_blk = 2 * tco * Ci * x_itemsize + 2 * tco * 4  # weights + bias (double-buffered)
        return x_blk + o_blk + tmp + w_blk

    def fits(thw, tco):
        return step_bytes(thw, tco) <= budget

    TCo = Co
    if fits(HW_pad, TCo):
        THW = HW_pad                                   # whole (Ci,HW) slab: one contiguous DMA/batch
    else:
        THW = min(_round_up(HW_pad, 128), 2048)        # target 512-2048 lanes
        while THW > 512 and not fits(THW, TCo):
            THW -= 128
        # Prefer tiling Co over shrinking lanes below 512 (keeps stores wide; x is not
        # re-DMA'd across Co tiles because its index_map ignores that grid axis).
        while not fits(THW, TCo) and TCo > 8:
            TCo = max(8, _round_up(TCo // 2, 8))
        while not fits(THW, TCo) and THW > 128:
            THW -= 128
    THW = min(THW, _round_up(HW_pad, 128))

    n_hw = pl.cdiv(HW_pad, THW)
    n_co = pl.cdiv(Co, TCo)

    # v7x megacore: guarantee >=2 grid steps so both TensorCores get work.
    if B * n_hw * n_co < 2:
        if HW_pad >= 256:
            THW = _round_up(pl.cdiv(HW_pad, 2), 128)
            n_hw = pl.cdiv(HW_pad, THW)
        elif Co >= 16:
            TCo = _round_up(pl.cdiv(Co, 2), 8)
            n_co = pl.cdiv(Co, TCo)

    return THW, TCo, n_hw, n_co, step_bytes(THW, TCo)


def conv1x1_bn_relu(x, w, gamma, beta, running_mean, running_var,
                    eps=1e-5, stride=1, groups=1, compute_dtype=None):
    """Fused Conv1x1 (no bias) + BatchNorm2d (eval, running stats) + ReLU.

    x: (B, Ci, H, W).  w: (Co, Ci, 1, 1).  gamma/beta/running_mean/running_var: (Co,).
    compute_dtype: optionally run the kernel in e.g. bf16 (x and folded weight are cast);
    the MXU accumulation and bias stay f32, the output is stored in compute_dtype.
    """
    # TODO(synk): grouped 1x1 conv (groups > 1) not implemented; module default is groups=1.
    assert groups == 1, "grouped 1x1 conv not supported by this kernel"
    if stride != 1:
        x = x[:, :, ::stride, ::stride]                # 1x1 conv with stride == subsample
    B, Ci, H, W = x.shape
    Co = w.shape[0]
    HW = H * W

    cdt = jnp.dtype(compute_dtype) if compute_dtype is not None else x.dtype
    out_dtype = cdt

    # Fold BN (inference running stats) into the conv weight + bias (tiny arrays).
    inv_std = jax.lax.rsqrt(running_var.astype(jnp.float32) + eps)
    scale = gamma.astype(jnp.float32) * inv_std                                # (Co,)
    w_eff = (w.reshape(Co, Ci).astype(jnp.float32) * scale[:, None]).astype(cdt)
    b_eff = (beta.astype(jnp.float32)
             - running_mean.astype(jnp.float32) * scale).reshape(Co, 1)        # keep f32

    # Channels on sublanes, spatial on lanes (free reshape, no transposes).
    xr = x.reshape(B, Ci, HW).astype(cdt)

    # Lane-dense output: pad small / awkward HW up to a multiple of 128 so every store is a
    # full-width vst. Large non-multiple HW keeps a ragged tail tile (Pallas masks OOB)
    # instead of paying a whole-tensor pad copy.
    HW_pad = HW
    if HW % 128 != 0 and HW <= 2048:
        HW_pad = _round_up(HW, 128)
        xr = jnp.pad(xr, ((0, 0), (0, 0), (0, HW_pad - HW)))

    x_itemsize = jnp.dtype(cdt).itemsize
    out_itemsize = jnp.dtype(out_dtype).itemsize
    vmem_cap = _vmem_capacity_bytes()
    THW, TCo, n_hw, n_co, blk_bytes = _select_tiles(
        B, Ci, Co, HW_pad, x_itemsize, out_itemsize, vmem_cap)

    # Scoped-VMEM limit: actual per-step footprint + headroom, capped per generation
    # (<= 32 MiB on v7x's 64 MiB part, <= vmem_cap/2 on 128 MiB v5e/v6e).
    vmem_limit = int(min(max(2 * blk_bytes, 16 << 20), max(vmem_cap // 2, 32 << 20)))

    grid = (B, n_hw, n_co)   # Co-tiles innermost: x block index ignores it -> no x re-DMA

    def run(single_buffer_weights):
        wspec_kw = {}
        if single_buffer_weights:
            # Constant-index weight/bias blocks: a single buffer frees VMEM for larger tiles.
            wspec_kw = dict(pipeline_mode=pl.Buffered(1))
        return pl.pallas_call(
            conv1x1_bn_relu_kernel,
            out_shape=jax.ShapeDtypeStruct((B, Co, HW_pad), out_dtype),
            grid=grid,
            in_specs=[
                pl.BlockSpec((1, Ci, THW), lambda b, t, c: (b, 0, t)),
                pl.BlockSpec((TCo, Ci), lambda b, t, c: (c, 0), **wspec_kw),
                pl.BlockSpec((TCo, 1), lambda b, t, c: (c, 0), **wspec_kw),
            ],
            out_specs=pl.BlockSpec((1, TCo, THW), lambda b, t, c: (b, c, t)),
            compiler_params=pltpu.CompilerParams(
                dimension_semantics=("parallel", "parallel", "parallel"),
                vmem_limit_bytes=vmem_limit,
            ),
        )(xr, w_eff, b_eff)

    try:
        out = run(single_buffer_weights=(n_co == 1))
    except Exception:
        out = run(single_buffer_weights=False)   # fall back if Buffered(1) path is unsupported

    if HW_pad != HW:
        out = out[:, :, :HW]
    return out.reshape(B, Co, H, W)


def reference_conv1x1_bn_relu(x, w, gamma, beta, mean, var, eps=1e-5, stride=1):
    if stride != 1:
        x = x[:, :, ::stride, ::stride]
    Co, Ci = w.shape[0], w.shape[1]
    y = jnp.einsum('oi,bihw->bohw', w.reshape(Co, Ci), x,
                   precision=jax.lax.Precision.HIGHEST)
    inv_std = jax.lax.rsqrt(var + eps)
    y = (y - mean[None, :, None, None]) * (gamma * inv_std)[None, :, None, None] \
        + beta[None, :, None, None]
    return jnp.maximum(y, 0.0)


def _make_inputs(key, B, Cin, Cout, H, W):
    kx, kw, kg, kb, km, kv = jax.random.split(key, 6)
    x = jax.random.normal(kx, (B, Cin, H, W), dtype=jnp.float32)
    w = jax.random.normal(kw, (Cout, Cin, 1, 1), dtype=jnp.float32) * 0.1
    gamma = 1.0 + 0.1 * jax.random.normal(kg, (Cout,), dtype=jnp.float32)
    beta = 0.1 * jax.random.normal(kb, (Cout,), dtype=jnp.float32)
    mean = 0.1 * jax.random.normal(km, (Cout,), dtype=jnp.float32)
    var = jax.random.uniform(kv, (Cout,), dtype=jnp.float32, minval=0.5, maxval=1.5)
    return x, w, gamma, beta, mean, var


if __name__ == "__main__":
    key = jax.random.PRNGKey(0)
    k1, k2 = jax.random.split(key, 2)

    # Case 1: HW a multiple of 128 (no pad), whole-slab tile per batch image.
    B, Cin, Cout, H, W = 2, 16, 32, 16, 16
    x, w, g, b, m, v = _make_inputs(k1, B, Cin, Cout, H, W)
    out = jax.block_until_ready(conv1x1_bn_relu(x, w, g, b, m, v))
    ref = reference_conv1x1_bn_relu(x, w, g, b, m, v)
    assert out.shape == (B, Cout, H, W)
    err = jnp.max(jnp.abs(out - ref))
    assert jnp.allclose(out, ref, atol=1e-5, rtol=1e-5), f"case1 mismatch (max abs err {err})"

    # Case 2: stride=2 and small odd spatial (14x14 -> 7x7, HW=49 padded to 128 lanes).
    B2, Cin2, Cout2, H2, W2, stride2 = 2, 8, 24, 14, 14, 2
    x2, w2, g2, b2, m2, v2 = _make_inputs(k2, B2, Cin2, Cout2, H2, W2)
    out2 = jax.block_until_ready(conv1x1_bn_relu(x2, w2, g2, b2, m2, v2, stride=stride2))
    ref2 = reference_conv1x1_bn_relu(x2, w2, g2, b2, m2, v2, stride=stride2)
    assert out2.shape == (B2, Cout2, 7, 7)
    err2 = jnp.max(jnp.abs(out2 - ref2))
    assert jnp.allclose(out2, ref2, atol=1e-5, rtol=1e-5), f"case2 mismatch (max abs err {err2})"

    print("KERNEL_OK")
</pallas_src>

<mosaic_0001>
module attributes {stable_mosaic.version = 11 : i64} {
  func.func @conv1x1_bn_relu_kernel(%arg0: i32, %arg1: i32, %arg2: i32, %arg3: memref<1x16x256xf32, #tpu.memory_space<vmem>>, %arg4: memref<32x16xf32, #tpu.memory_space<vmem>>, %arg5: memref<32x1xf32, #tpu.memory_space<vmem>>, %arg6: memref<1x32x256xf32, #tpu.memory_space<vmem>>) attributes {dimension_semantics = [#tpu.dimension_semantics<parallel>, #tpu.dimension_semantics<parallel>, #tpu.dimension_semantics<parallel>], iteration_bounds = array<i64: 2, 1, 1>, scalar_prefetch = 0 : i64, scratch_operands = 0 : i64, tpu.core_type = #tpu.core_type<tc>, window_params = [{transform_indices = @transform_0, window_bounds = array<i64: 1, 16, 256>}, {pipeline_mode = #tpu.pipeline_mode<synchronous>, transform_indices = @transform_1, window_bounds = array<i64: 32, 16>}, {pipeline_mode = #tpu.pipeline_mode<synchronous>, transform_indices = @transform_2, window_bounds = array<i64: 32, 1>}, {transform_indices = @transform_3, window_bounds = array<i64: 1, 32, 256>}]} {
    %c0 = arith.constant 0 : index
    %c0_0 = arith.constant 0 : index
    %0 = vector.load %arg4[%c0, %c0_0] : memref<32x16xf32, #tpu.memory_space<vmem>>, vector<32x16xf32>
    %c0_1 = arith.constant 0 : index
    %c0_2 = arith.constant 0 : index
    %c0_3 = arith.constant 0 : index
    %1 = vector.load %arg3[%c0_1, %c0_2, %c0_3] : memref<1x16x256xf32, #tpu.memory_space<vmem>>, vector<1x16x256xf32>
    %2 = vector.shape_cast %1 : vector<1x16x256xf32> to vector<16x256xf32>
    %cst = arith.constant dense<0.000000e+00> : vector<32x256xf32>
    %3 = tpu.matmul %0, %2, %cst {dimension_numbers = #tpu.dot_dimension_numbers<[1], [0], [0], [1], [0, 0, 1, 1], [], []>} : vector<32x16xf32>, vector<16x256xf32>, vector<32x256xf32> -> vector<32x256xf32>
    %c0_4 = arith.constant 0 : index
    %c0_5 = arith.constant 0 : index
    %4 = vector.load %arg5[%c0_4, %c0_5] : memref<32x1xf32, #tpu.memory_space<vmem>>, vector<32x1xf32>
    %5 = vector.broadcast %4 : vector<32x1xf32> to vector<32x256xf32>
    %6 = arith.addf %3, %5 : vector<32x256xf32>
    %cst_6 = arith.constant 0.000000e+00 : f32
    %7 = vector.broadcast %cst_6 : f32 to vector<32x256xf32>
    %8 = arith.maximumf %6, %7 : vector<32x256xf32>
    %c0_7 = arith.constant 0 : index
    %c0_8 = arith.constant 0 : index
    %c0_9 = arith.constant 0 : index
    %9 = vector.load %arg6[%c0_7, %c0_8, %c0_9] : memref<1x32x256xf32, #tpu.memory_space<vmem>>, vector<1x32x256xf32>
    %10 = vector.shape_cast %9 : vector<1x32x256xf32> to vector<32x256xf32>
    %11 = vector.shape_cast %8 : vector<32x256xf32> to vector<1x32x256xf32>
    tpu.vector_store %arg6[%c0_7, %c0_8, %c0_9], %11 {strides = array<i32>} : memref<1x32x256xf32, #tpu.memory_space<vmem>>, vector<1x32x256xf32>,
    return
  }
  func.func @transform_0(%arg0: i32, %arg1: i32, %arg2: i32) -> (i32, i32, i32) {
    %c0_i32 = arith.constant 0 : i32
    %c0_i32_0 = arith.constant 0 : i32
    return %arg0, %c0_i32, %arg1 : i32, i32, i32
  }
  func.func @transform_1(%arg0: i32, %arg1: i32, %arg2: i32) -> (i32, i32) {
    %c0_i32 = arith.constant 0 : i32
    %c0_i32_0 = arith.constant 0 : i32
    return %arg2, %c0_i32 : i32, i32
  }
  func.func @transform_2(%arg0: i32, %arg1: i32, %arg2: i32) -> (i32, i32) {
    %c0_i32 = arith.constant 0 : i32
    %c0_i32_0 = arith.constant 0 : i32
    return %arg2, %c0_i32 : i32, i32
  }
  func.func @transform_3(%arg0: i32, %arg1: i32, %arg2: i32) -> (i32, i32, i32) {
    %c0_i32 = arith.constant 0 : i32
    return %arg0, %arg2, %arg1 : i32, i32, i32
  }
}

module attributes {stable_mosaic.version = 11 : i64} {
  func.func @conv1x1_bn_relu_kernel(%arg0: i32, %arg1: i32, %arg2: i32, %arg3: memref<1x16x256xf32, #tpu.memory_space<vmem>>, %arg4: memref<32x16xf32, #tpu.memory_space<vmem>>, %arg5: memref<32x1xf32, #tpu.memory_space<vmem>>, %arg6: memref<1x32x256xf32, #tpu.memory_space<vmem>>) attributes {dimension_semantics = [#tpu.dimension_semantics<parallel>, #tpu.dimension_semantics<parallel>, #tpu.dimension_semantics<parallel>], iteration_bounds = array<i64: 2, 1, 1>, scalar_prefetch = 0 : i64, scratch_operands = 0 : i64, tpu.core_type = #tpu.core_type<tc>, window_params = [{transform_indices = @transform_0, window_bounds = array<i64: 1, 16, 256>}, {transform_indices = @transform_1, window_bounds = array<i64: 32, 16>}, {transform_indices = @transform_2, window_bounds = array<i64: 32, 1>}, {transform_indices = @transform_3, window_bounds = array<i64: 1, 32, 256>}]} {
    %c0 = arith.constant 0 : index
    %c0_0 = arith.constant 0 : index
    %0 = vector.load %arg4[%c0, %c0_0] : memref<32x16xf32, #tpu.memory_space<vmem>>, vector<32x16xf32>
    %c0_1 = arith.constant 0 : index
    %c0_2 = arith.constant 0 : index
    %c0_3 = arith.constant 0 : index
    %1 = vector.load %arg3[%c0_1, %c0_2, %c0_3] : memref<1x16x256xf32, #tpu.memory_space<vmem>>, vector<1x16x256xf32>
    %2 = vector.shape_cast %1 : vector<1x16x256xf32> to vector<16x256xf32>
    %cst = arith.constant dense<0.000000e+00> : vector<32x256xf32>
    %3 = tpu.matmul %0, %2, %cst {dimension_numbers = #tpu.dot_dimension_numbers<[1], [0], [0], [1], [0, 0, 1, 1], [], []>} : vector<32x16xf32>, vector<16x256xf32>, vector<32x256xf32> -> vector<32x256xf32>
    %c0_4 = arith.constant 0 : index
    %c0_5 = arith.constant 0 : index
    %4 = vector.load %arg5[%c0_4, %c0_5] : memref<32x1xf32, #tpu.memory_space<vmem>>, vector<32x1xf32>
    %5 = vector.broadcast %4 : vector<32x1xf32> to vector<32x256xf32>
    %6 = arith.addf %3, %5 : vector<32x256xf32>
    %cst_6 = arith.constant 0.000000e+00 : f32
    %7 = vector.broadcast %cst_6 : f32 to vector<32x256xf32>
    %8 = arith.maximumf %6, %7 : vector<32x256xf32>
    %c0_7 = arith.constant 0 : index
    %c0_8 = arith.constant 0 : index
    %c0_9 = arith.constant 0 : index
    %9 = vector.load %arg6[%c0_7, %c0_8, %c0_9] : memref<1x32x256xf32, #tpu.memory_space<vmem>>, vector<1x32x256xf32>
    %10 = vector.shape_cast %9 : vector<1x32x256xf32> to vector<32x256xf32>
    %11 = vector.shape_cast %8 : vector<32x256xf32> to vector<1x32x256xf32>
    tpu.vector_store %arg6[%c0_7, %c0_8, %c0_9], %11 {strides = array<i32>} : memref<1x32x256xf32, #tpu.memory_space<vmem>>, vector<1x32x256xf32>,
    return
  }
  func.func @transform_0(%arg0: i32, %arg1: i32, %arg2: i32) -> (i32, i32, i32) {
    %c0_i32 = arith.constant 0 : i32
    %c0_i32_0 = arith.constant 0 : i32
    return %arg0, %c0_i32, %arg1 : i32, i32, i32
  }
  func.func @transform_1(%arg0: i32, %arg1: i32, %arg2: i32) -> (i32, i32) {
    %c0_i32 = arith.constant 0 : i32
    %c0_i32_0 = arith.constant 0 : i32
    return %arg2, %c0_i32 : i32, i32
  }
  func.func @transform_2(%arg0: i32, %arg1: i32, %arg2: i32) -> (i32, i32) {
    %c0_i32 = arith.constant 0 : i32
    %c0_i32_0 = arith.constant 0 : i32
    return %arg2, %c0_i32 : i32, i32
  }
  func.func @transform_3(%arg0: i32, %arg1: i32, %arg2: i32) -> (i32, i32, i32) {
    %c0_i32 = arith.constant 0 : i32
    return %arg0, %arg2, %arg1 : i32, i32, i32
  }
}

</mosaic_0001>

<bundles_post_ra>
// kernel: tpu_custom_call.1
= control target key start
LH: loop header
LB: loop body
LE: loop exit
PB: predicated region body
PF: predicated region fallthrough
CT: control target
= control target key end

     0   :  { %8 = vsyncpa [#allocation3], 0  ;;  %s844_s0 = inlined_call_operand.vmem [shape: f32[2,16,256], index: 0, kind: input, shape index: {}]   ;;  %s845_s1 = inlined_call_operand.vmem [shape: f32[32,16], index: 1, kind: input, shape index: {}]   ;;  %s846_s2 = inlined_call_operand.vmem [shape: f32[32,1], index: 2, kind: input, shape index: {}]   ;;  %s847_s3 = inlined_call_operand.hbm [shape: f32[2,32,256], index: 3, kind: output, shape index: {}]  }
   0x1   :  { %10 = vsyncpa [#allocation3 + $0x1], 0  ;;  %s700_s12 = smov 0   ;;  %s702_s13 = smov 0  }
   0x2   :  { %s704_s14 = smov 0   ;;  %s706_s15 = smov 0  }
   0x3   :  { %s708_s16 = smov 0   ;;  %s710_s17 = smov 0  }
   0x4 LB: > { %s508_s18 = sadd.s32 4294967295, %s675_s17   ;;  %s509_s19 = sadd.s32 4294967294, %s675_s17   ;;  %s675_s17 = sphi %s710_s17, %s16_s17   ;;  %s671_s16 = sphi %s708_s16, %s854_s16   ;;  %s667_s15 = sphi %s706_s15, %s853_s15   ;;  %s663_s14 = sphi %s704_s14, %s852_s14   ;;  %s659_s13 = sphi %s702_s13, %s851_s13   ;;  %s655_s12 = sphi %s700_s12, %s850_s12  }
   0x5   : > { %s35_s20 = sadd.s32 1, %s671_s16  ;;  %s126_s21 = sadd.s32 1, %s663_s14 }
   0x6   : > { %p37_p0 = scmp.ge.s32.totalorder %s35_s20, 2  ;;  %p136_p1 = scmp.ne.s32.totalorder %s663_s14, %s659_s13 }
   0x7   : > { %p137_p2 = scmp.eq.s32.totalorder %s508_s18, 1  ;;  %p142_p3 = scmp.ne.s32.totalorder %s659_s13, %s655_s12 }
   0x8   : > { %s856_s20 = smov (%p37_p0, %s35_s20), 0  ;;  %p143_p5 = scmp.eq.s32.totalorder %s509_s19, 1 }
   0x9   : > { %p740_p4 = por %p137_p2, %p136_p1  ;;  %s119_s23 = ssub.s32 %s671_s16, %s856_s20 }
   0xa   : > { %p514_p6 = scmp.ge.s32.totalorder %s675_s17, 1  ;;  %p124_p7 = scmp.eq.s32.totalorder %s119_s23, 0 }
   0xb   : > { %p747_p8 = por %p143_p5, %p142_p3  ;;  %p192_p9 = scmp.lt.s32.totalorder %s675_s17, 3 }
   0xc   : > { %s753_s25 = scalar_select %p124_p7, %s663_s14, %s126_s21  }
   0xd   : > { %p193_p10 = pnand %p514_p6, %p192_p9 }
   0xe   : > { %p231_p11 = scmp.lt.s32.totalorder (!%p193_p10), %s667_s15, 1  ;;  %s532_s6 = sshll.u32 (!%p193_p10), %s667_s15, 6 }
   0xf   : > { %196 = sbr.rel (%p193_p10) target bundleno = 178 (0xb2), region = 32  ;;  %s390_s9 = scalar_lea.hbm (!%p193_p10), %s847_s3, %s532_s6 }
  0x10   : > { %s393_s10 = sshll.u32 (!%p193_p10), %s390_s9, 4  ;;  %s617_s26 = scalar_lea.hbm (!%p193_p10), %s847_s3, 128  ;;  %s394_s10 = int_to_ptr.hbm [resolvable:$true] %s393_s10 }
  0x11   : > { %s611_s18 = sshra.s32 (!%p193_p10), %s394_s10, 4  ;;  %s612_s18 = int_to_ptr.hbm [resolvable:$true] %s611_s18 }
  0x12   : > { %s613_s19 = scalar_lea.hbm (!%p193_p10), %s612_s18, 64  ;;  %p618_p1 = scmp.lt.s32.totalorder (!%p193_p10), %s612_s18, %s847_s3 }
  0x13   : > { %p614_p12 = scmp.ne.s32.totalorder (!%p193_p10), %s612_s18, %s613_s19  ;;  %p619_p2 = scmp.lt.s32.totalorder (!%p193_p10), %s617_s26, %s613_s19 }
  0x14   : > { %v677_v0 = vmov 0   ;;  %v264_v1 = vld [vmem:[%s846_s2 + $0x10] sm:$0xff]  ;;  %v262_v2 = vld [vmem:[%s846_s2] sm:$0xff]  ;;  %s232_s30 = scalar_select %p231_p11, %s667_s15, 1  ;;  %vm286_vm0 = vcmask 130048   ;;  %v265_v9 = vld [vmem:[%s846_s2 + $0x18] sm:$0xff] }
  0x15   : > { %596 = vset.pattern.permute.xlu1 %v677_v0  ;;  %595 = vset.pattern.permute.xlu0 %v677_v0  ;;  %v254_v7 = vld [vmem:[%s845_s1] sm:$0xff]  ;;  %v256_v8 = vld [vmem:[%s845_s1 + $0x10] sm:$0xff]  ;;  %v263_v10 = vld [vmem:[%s846_s2 + $0x8] sm:$0xff]  ;;  %p615_p13 = pnand %p614_p12, %p740_p4  ;;  %p620_p3 = por %p619_p2, %p618_p1 }
  0x16   : > { %278 = vperm.xlu1 %596, %v264_v1   ;;  %268 = vperm.xlu0 %595, %v262_v2   ;;  %s531_s4 = sshll.u32 %s232_s30, 5  ;;  %v255_v11 = vld [vmem:[%s845_s1 + $0x8] sm:$0xff]  ;;  %v257_v12 = vld [vmem:[%s845_s1 + $0x18] sm:$0xff]  ;;  %s227_s30 = sand.u32 1, %s659_s13  }
  0x17   : > { %s238_s7 = scalar_lea.vmem %s844_s0, %s531_s4  ;;  %s515_s4 = sshll.u32 %s227_s30, 6 }
  0x18   : > { %v260_v3 = vld [vmem:[%s238_s7 + $0x10] sm:$0xff]  ;;  %v261_v4 = vld [vmem:[%s238_s7 + $0x18] sm:$0xff]  ;;  %v258_v5 = vld [vmem:[%s238_s7] sm:$0xff]  ;;  %s795_s5 = scalar_lea.vmem [#allocation2], %s515_s4  ;;  %s374_s11 = scalar_lea.sflag [#allocation3], %s227_s30 }
  0x19   : > { %313 = vmatpush.msra.mxu0 %v260_v3  ;;  %533 = vmatpush.msra.mxu2 %v260_v3  ;;  %v259_v6 = vld [vmem:[%s238_s7 + $0x8] sm:$0xff]  ;;  %s391_s15 = sshll.u32 %s795_s5, 4  ;;  %p616_p0 = pneg %p615_p13  ;;  %s392_s15 = int_to_ptr.vmem [resolvable:$true] %s391_s15 }
  0x1a   : > { %342 = vmatpush.msra.mxu1 %v261_v4  ;;  %535 = vmatpush.msra.mxu3 %v261_v4 }
  0x1b   : > { %314 = vmatpush.msra.mxu0 %v258_v5  ;;  %534 = vmatpush.msra.mxu2 %v258_v5  ;;  %p621_p5 = pnand %p620_p3, %p616_p0 }
  0x1c   : > { %343 = vmatpush.msra.mxu1 %v259_v6  ;;  %536 = vmatpush.msra.mxu3 %v259_v6 }
  0x1d   : > { %518 = vmatmul.msk.f32.vlgmr.msra.gmra.mxu0 %vm286_vm0, %v254_v7  ;;  %520 = vmatmul.msk.f32.vlgmr.msra.gmra.mxu2 %vm286_vm0, %v256_v8 }
  0x1e   : > { %522 = vmatmul.msk.f32.vlgmr.msra.gmra.mxu1 %vm286_vm0, %v254_v7  ;;  %524 = vmatmul.msk.f32.vlgmr.msra.gmra.mxu3 %vm286_vm0, %v256_v8 }
  0x1f   : > { %283 = vperm.xlu1 %596, %v265_v9   ;;  %273 = vperm.xlu0 %595, %v263_v10  }
  0x25   : > { %519 = vmatmul.msk.f32.gmra.mxu0 %vm286_vm0, %v255_v11  ;;  %521 = vmatmul.msk.f32.gmra.mxu2 %vm286_vm0, %v257_v12 }
  0x26   : > { %523 = vmatmul.msk.f32.gmra.mxu1 %vm286_vm0, %v255_v11  ;;  %525 = vmatmul.msk.f32.gmra.mxu3 %vm286_vm0, %v257_v12 }
  0x88   : > { %v269_v13 = vpop.permute.xlu0 %268  ;;  %v279_v19 = vpop.permute.xlu1 %278 }
  0x91   : > { %v274_v24 = vpop.permute.xlu0 %273  ;;  %v284_v34 = vpop.permute.xlu1 %283 }
  0x9a   : > { %v316_v14 = vpop.f32.mrf.mxu0 }
  0x9b   : > { %v317_v15 = vadd.f32 %v316_v14, %v269_v13  ;;  %v345_v16 = vpop.f32.mrf.mxu1 }
  0x9c   : > { %v346_v17 = vadd.f32 %v345_v16, %v269_v13 }
  0x9d   : > { %v357_v18 = vmax.f32 %v317_v15, 0.0 }
  0x9e   : > { %v358_v20 = vmax.f32 %v346_v17, 0.0 }
  0x9f   : > { %365 = vst [vmem:[%s795_s5] sm:$0xff] %v357_v18 }
  0xa0   : > { %366 = vst [vmem:[%s795_s5 + $0x8] sm:$0xff] %v358_v20  ;;  %v322_v21 = vpop.f32.mrf.mxu2 }
  0xa1   : > { %v323_v22 = vadd.f32 %v322_v21, %v279_v19  ;;  %v351_v23 = vpop.f32.mrf.mxu3 }
  0xa2   : > { %v352_v25 = vadd.f32 %v351_v23, %v279_v19  ;;  %v319_v26 = vpop.f32.mrf.mxu0 }
  0xa3   : > { %v361_v27 = vmax.f32 %v323_v22, 0.0  ;;  %v320_v28 = vadd.f32 %v319_v26, %v274_v24  ;;  %v348_v29 = vpop.f32.mrf.mxu1 }
  0xa4   : > { %v362_v30 = vmax.f32 %v352_v25, 0.0  ;;  %v349_v31 = vadd.f32 %v348_v29, %v274_v24 }
  0xa5   : > { %369 = vst [vmem:[%s795_s5 + $0x20] sm:$0xff] %v361_v27  ;;  %v359_v32 = vmax.f32 %v320_v28, 0.0 }
  0xa6   : > { %370 = vst [vmem:[%s795_s5 + $0x28] sm:$0xff] %v362_v30  ;;  %v360_v33 = vmax.f32 %v349_v31, 0.0 }
  0xa7   : > { %367 = vst [vmem:[%s795_s5 + $0x10] sm:$0xff] %v359_v32 }
  0xa8   : > { %368 = vst [vmem:[%s795_s5 + $0x18] sm:$0xff] %v360_v33  ;;  %v325_v35 = vpop.f32.mrf.mxu2 }
  0xa9   : > { %v326_v36 = vadd.f32 %v325_v35, %v284_v34  ;;  %v354_v37 = vpop.f32.mrf.mxu3 }
  0xaa   : > { %v355_v38 = vadd.f32 %v354_v37, %v284_v34 }
  0xab   : > { %v363_v39 = vmax.f32 %v326_v36, 0.0 }
  0xac   : > { %v364_v40 = vmax.f32 %v355_v38, 0.0 }
  0xad   : > { %371 = vst [vmem:[%s795_s5 + $0x30] sm:$0xff] %v363_v39 }
  0xae   : > { %372 = vst [vmem:[%s795_s5 + $0x38] sm:$0xff] %v364_v40 }
  0xaf   : > { %624 = shalt.err (!%p621_p5)
}
  0xb0   : > { %s678_s29 = smov 256   ;;  %s679_s30 = smov 16  }
  0xb1   : > { %537 = dma.vmem_to_hbm [thread:$0]  (%p740_p4), %s392_s15, 1024, %s394_s10, %s374_s11, %s678_s29, %s678_s29, %s679_s30  }
  0xb2 PF: > { %p543_p6 = scmp.ge.s32.totalorder %s675_s17, 2  ;;  %s408_s4 = sand.u32 1, %s655_s12  }
  0xb3   : > { %s409_s5 = scalar_lea.sflag [#allocation3], %s408_s4 }
  0xb4   : > { %p540_p7 = pnand %p543_p6, %p747_p8 }
  0xb6   : > { %p541_p9 = pneg %p540_p7 }
  0xb8   : > { %650 = dma.done.wait (%p541_p9), %s409_s5, 1024  }
  0xb9   : > { %652 = vsyncadd (%p541_p9), %s409_s5, 4294966272  ;;  %s16_s17 = sadd.s32 1, %s675_s17   ;;  %s850_s12 = smov %s659_s13 }
  0xba   : > { %p13_p10 = scmp.ge.s32.totalorder %s16_s17, 4   ;;  %s851_s13 = smov %s663_s14 }
  0xbb   : > { %s852_s14 = smov %s753_s25  ;;  %s853_s15 = smov %s671_s16 }
  0xbc   : > { %s854_s16 = smov %s856_s20  ;;  %15 = sbr.rel (!%p13_p10) target bundleno = 4 (0x4), region = 73 }
  0xc1   :  { %415 = vsyncpa [#allocation3], 1 }
  0xc2   :  { %417 = vsyncpa [#allocation3 + $0x1], 1 }

// kernel: tpu_custom_call.1
= control target key start
LH: loop header
LB: loop body
LE: loop exit
PB: predicated region body
PF: predicated region fallthrough
CT: control target
= control target key end

     0   :  { %8 = vsyncpa [#allocation3], 0  ;;  %s844_s0 = inlined_call_operand.vmem [shape: f32[2,16,256], index: 0, kind: input, shape index: {}]   ;;  %s845_s1 = inlined_call_operand.vmem [shape: f32[32,16], index: 1, kind: input, shape index: {}]   ;;  %s846_s2 = inlined_call_operand.vmem [shape: f32[32,1], index: 2, kind: input, shape index: {}]   ;;  %s847_s3 = inlined_call_operand.hbm [shape: f32[2,32,256], index: 3, kind: output, shape index: {}]  }
   0x1   :  { %10 = vsyncpa [#allocation3 + $0x1], 0  ;;  %s700_s12 = smov 0   ;;  %s702_s13 = smov 0  }
   0x2   :  { %s704_s14 = smov 0   ;;  %s706_s15 = smov 0  }
   0x3   :  { %s708_s16 = smov 0   ;;  %s710_s17 = smov 0  }
   0x4 LB: > { %s508_s18 = sadd.s32 4294967295, %s675_s17   ;;  %s509_s19 = sadd.s32 4294967294, %s675_s17   ;;  %s675_s17 = sphi %s710_s17, %s16_s17   ;;  %s671_s16 = sphi %s708_s16, %s854_s16   ;;  %s667_s15 = sphi %s706_s15, %s853_s15   ;;  %s663_s14 = sphi %s704_s14, %s852_s14   ;;  %s659_s13 = sphi %s702_s13, %s851_s13   ;;  %s655_s12 = sphi %s700_s12, %s850_s12  }
   0x5   : > { %s35_s20 = sadd.s32 1, %s671_s16  ;;  %s126_s21 = sadd.s32 1, %s663_s14 }
   0x6   : > { %p37_p0 = scmp.ge.s32.totalorder %s35_s20, 2  ;;  %p136_p1 = scmp.ne.s32.totalorder %s663_s14, %s659_s13 }
   0x7   : > { %p137_p2 = scmp.eq.s32.totalorder %s508_s18, 1  ;;  %p142_p3 = scmp.ne.s32.totalorder %s659_s13, %s655_s12 }
   0x8   : > { %s856_s20 = smov (%p37_p0, %s35_s20), 0  ;;  %p143_p5 = scmp.eq.s32.totalorder %s509_s19, 1 }
   0x9   : > { %p740_p4 = por %p137_p2, %p136_p1  ;;  %s119_s23 = ssub.s32 %s671_s16, %s856_s20 }
   0xa   : > { %p514_p6 = scmp.ge.s32.totalorder %s675_s17, 1  ;;  %p124_p7 = scmp.eq.s32.totalorder %s119_s23, 0 }
   0xb   : > { %p747_p8 = por %p143_p5, %p142_p3  ;;  %p192_p9 = scmp.lt.s32.totalorder %s675_s17, 3 }
   0xc   : > { %s753_s25 = scalar_select %p124_p7, %s663_s14, %s126_s21  }
   0xd   : > { %p193_p10 = pnand %p514_p6, %p192_p9 }
   0xe   : > { %p231_p11 = scmp.lt.s32.totalorder (!%p193_p10), %s667_s15, 1  ;;  %s532_s6 = sshll.u32 (!%p193_p10), %s667_s15, 6 }
   0xf   : > { %196 = sbr.rel (%p193_p10) target bundleno = 178 (0xb2), region = 32  ;;  %s390_s9 = scalar_lea.hbm (!%p193_p10), %s847_s3, %s532_s6 }
  0x10   : > { %s393_s10 = sshll.u32 (!%p193_p10), %s390_s9, 4  ;;  %s617_s26 = scalar_lea.hbm (!%p193_p10), %s847_s3, 128  ;;  %s394_s10 = int_to_ptr.hbm [resolvable:$true] %s393_s10 }
  0x11   : > { %s611_s18 = sshra.s32 (!%p193_p10), %s394_s10, 4  ;;  %s612_s18 = int_to_ptr.hbm [resolvable:$true] %s611_s18 }
  0x12   : > { %s613_s19 = scalar_lea.hbm (!%p193_p10), %s612_s18, 64  ;;  %p618_p1 = scmp.lt.s32.totalorder (!%p193_p10), %s612_s18, %s847_s3 }
  0x13   : > { %p614_p12 = scmp.ne.s32.totalorder (!%p193_p10), %s612_s18, %s613_s19  ;;  %p619_p2 = scmp.lt.s32.totalorder (!%p193_p10), %s617_s26, %s613_s19 }
  0x14   : > { %v677_v0 = vmov 0   ;;  %v264_v1 = vld [vmem:[%s846_s2 + $0x10] sm:$0xff]  ;;  %v262_v2 = vld [vmem:[%s846_s2] sm:$0xff]  ;;  %s232_s30 = scalar_select %p231_p11, %s667_s15, 1  ;;  %vm286_vm0 = vcmask 130048   ;;  %v265_v9 = vld [vmem:[%s846_s2 + $0x18] sm:$0xff] }
  0x15   : > { %596 = vset.pattern.permute.xlu1 %v677_v0  ;;  %595 = vset.pattern.permute.xlu0 %v677_v0  ;;  %v254_v7 = vld [vmem:[%s845_s1] sm:$0xff]  ;;  %v256_v8 = vld [vmem:[%s845_s1 + $0x10] sm:$0xff]  ;;  %v263_v10 = vld [vmem:[%s846_s2 + $0x8] sm:$0xff]  ;;  %p615_p13 = pnand %p614_p12, %p740_p4  ;;  %p620_p3 = por %p619_p2, %p618_p1 }
  0x16   : > { %278 = vperm.xlu1 %596, %v264_v1   ;;  %268 = vperm.xlu0 %595, %v262_v2   ;;  %s531_s4 = sshll.u32 %s232_s30, 5  ;;  %v255_v11 = vld [vmem:[%s845_s1 + $0x8] sm:$0xff]  ;;  %v257_v12 = vld [vmem:[%s845_s1 + $0x18] sm:$0xff]  ;;  %s227_s30 = sand.u32 1, %s659_s13  }
  0x17   : > { %s238_s7 = scalar_lea.vmem %s844_s0, %s531_s4  ;;  %s515_s4 = sshll.u32 %s227_s30, 6 }
  0x18   : > { %v260_v3 = vld [vmem:[%s238_s7 + $0x10] sm:$0xff]  ;;  %v261_v4 = vld [vmem:[%s238_s7 + $0x18] sm:$0xff]  ;;  %v258_v5 = vld [vmem:[%s238_s7] sm:$0xff]  ;;  %s795_s5 = scalar_lea.vmem [#allocation2], %s515_s4  ;;  %s374_s11 = scalar_lea.sflag [#allocation3], %s227_s30 }
  0x19   : > { %313 = vmatpush.msra.mxu0 %v260_v3  ;;  %533 = vmatpush.msra.mxu2 %v260_v3  ;;  %v259_v6 = vld [vmem:[%s238_s7 + $0x8] sm:$0xff]  ;;  %s391_s15 = sshll.u32 %s795_s5, 4  ;;  %p616_p0 = pneg %p615_p13  ;;  %s392_s15 = int_to_ptr.vmem [resolvable:$true] %s391_s15 }
  0x1a   : > { %342 = vmatpush.msra.mxu1 %v261_v4  ;;  %535 = vmatpush.msra.mxu3 %v261_v4 }
  0x1b   : > { %314 = vmatpush.msra.mxu0 %v258_v5  ;;  %534 = vmatpush.msra.mxu2 %v258_v5  ;;  %p621_p5 = pnand %p620_p3, %p616_p0 }
  0x1c   : > { %343 = vmatpush.msra.mxu1 %v259_v6  ;;  %536 = vmatpush.msra.mxu3 %v259_v6 }
  0x1d   : > { %518 = vmatmul.msk.f32.vlgmr.msra.gmra.mxu0 %vm286_vm0, %v254_v7  ;;  %520 = vmatmul.msk.f32.vlgmr.msra.gmra.mxu2 %vm286_vm0, %v256_v8 }
  0x1e   : > { %522 = vmatmul.msk.f32.vlgmr.msra.gmra.mxu1 %vm286_vm0, %v254_v7  ;;  %524 = vmatmul.msk.f32.vlgmr.msra.gmra.mxu3 %vm286_vm0, %v256_v8 }
  0x1f   : > { %283 = vperm.xlu1 %596, %v265_v9   ;;  %273 = vperm.xlu0 %595, %v263_v10  }
  0x25   : > { %519 = vmatmul.msk.f32.gmra.mxu0 %vm286_vm0, %v255_v11  ;;  %521 = vmatmul.msk.f32.gmra.mxu2 %vm286_vm0, %v257_v12 }
  0x26   : > { %523 = vmatmul.msk.f32.gmra.mxu1 %vm286_vm0, %v255_v11  ;;  %525 = vmatmul.msk.f32.gmra.mxu3 %vm286_vm0, %v257_v12 }
  0x88   : > { %v269_v13 = vpop.permute.xlu0 %268  ;;  %v279_v19 = vpop.permute.xlu1 %278 }
  0x91   : > { %v274_v24 = vpop.permute.xlu0 %273  ;;  %v284_v34 = vpop.permute.xlu1 %283 }
  0x9a   : > { %v316_v14 = vpop.f32.mrf.mxu0 }
  0x9b   : > { %v317_v15 = vadd.f32 %v316_v14, %v269_v13  ;;  %v345_v16 = vpop.f32.mrf.mxu1 }
  0x9c   : > { %v346_v17 = vadd.f32 %v345_v16, %v269_v13 }
  0x9d   : > { %v357_v18 = vmax.f32 %v317_v15, 0.0 }
  0x9e   : > { %v358_v20 = vmax.f32 %v346_v17, 0.0 }
  0x9f   : > { %365 = vst [vmem:[%s795_s5] sm:$0xff] %v357_v18 }
  0xa0   : > { %366 = vst [vmem:[%s795_s5 + $0x8] sm:$0xff] %v358_v20  ;;  %v322_v21 = vpop.f32.mrf.mxu2 }
  0xa1   : > { %v323_v22 = vadd.f32 %v322_v21, %v279_v19  ;;  %v351_v23 = vpop.f32.mrf.mxu3 }
  0xa2   : > { %v352_v25 = vadd.f32 %v351_v23, %v279_v19  ;;  %v319_v26 = vpop.f32.mrf.mxu0 }
  0xa3   : > { %v361_v27 = vmax.f32 %v323_v22, 0.0  ;;  %v320_v28 = vadd.f32 %v319_v26, %v274_v24  ;;  %v348_v29 = vpop.f32.mrf.mxu1 }
  0xa4   : > { %v362_v30 = vmax.f32 %v352_v25, 0.0  ;;  %v349_v31 = vadd.f32 %v348_v29, %v274_v24 }
  0xa5   : > { %369 = vst [vmem:[%s795_s5 + $0x20] sm:$0xff] %v361_v27  ;;  %v359_v32 = vmax.f32 %v320_v28, 0.0 }
  0xa6   : > { %370 = vst [vmem:[%s795_s5 + $0x28] sm:$0xff] %v362_v30  ;;  %v360_v33 = vmax.f32 %v349_v31, 0.0 }
  0xa7   : > { %367 = vst [vmem:[%s795_s5 + $0x10] sm:$0xff] %v359_v32 }
  0xa8   : > { %368 = vst [vmem:[%s795_s5 + $0x18] sm:$0xff] %v360_v33  ;;  %v325_v35 = vpop.f32.mrf.mxu2 }
  0xa9   : > { %v326_v36 = vadd.f32 %v325_v35, %v284_v34  ;;  %v354_v37 = vpop.f32.mrf.mxu3 }
  0xaa   : > { %v355_v38 = vadd.f32 %v354_v37, %v284_v34 }
  0xab   : > { %v363_v39 = vmax.f32 %v326_v36, 0.0 }
  0xac   : > { %v364_v40 = vmax.f32 %v355_v38, 0.0 }
  0xad   : > { %371 = vst [vmem:[%s795_s5 + $0x30] sm:$0xff] %v363_v39 }
  0xae   : > { %372 = vst [vmem:[%s795_s5 + $0x38] sm:$0xff] %v364_v40 }
  0xaf   : > { %624 = shalt.err (!%p621_p5)
}
  0xb0   : > { %s678_s29 = smov 256   ;;  %s679_s30 = smov 16  }
  0xb1   : > { %537 = dma.vmem_to_hbm [thread:$0]  (%p740_p4), %s392_s15, 1024, %s394_s10, %s374_s11, %s678_s29, %s678_s29, %s679_s30  }
  0xb2 PF: > { %p543_p6 = scmp.ge.s32.totalorder %s675_s17, 2  ;;  %s408_s4 = sand.u32 1, %s655_s12  }
  0xb3   : > { %s409_s5 = scalar_lea.sflag [#allocation3], %s408_s4 }
  0xb4   : > { %p540_p7 = pnand %p543_p6, %p747_p8 }
  0xb6   : > { %p541_p9 = pneg %p540_p7 }
  0xb8   : > { %650 = dma.done.wait (%p541_p9), %s409_s5, 1024  }
  0xb9   : > { %652 = vsyncadd (%p541_p9), %s409_s5, 4294966272  ;;  %s16_s17 = sadd.s32 1, %s675_s17   ;;  %s850_s12 = smov %s659_s13 }
  0xba   : > { %p13_p10 = scmp.ge.s32.totalorder %s16_s17, 4   ;;  %s851_s13 = smov %s663_s14 }
  0xbb   : > { %s852_s14 = smov %s753_s25  ;;  %s853_s15 = smov %s671_s16 }
  0xbc   : > { %s854_s16 = smov %s856_s20  ;;  %15 = sbr.rel (!%p13_p10) target bundleno = 4 (0x4), region = 73 }
  0xc1   :  { %415 = vsyncpa [#allocation3], 1 }
  0xc2   :  { %417 = vsyncpa [#allocation3 + $0x1], 1 }

</bundles_post_ra>
